<compile_context>
chip_gen: v7x
topology: tpu7x:2x2x1
jax: 0.10.0
libtpu: 0.0.40
codegen_flags: <defaults>
</compile_context>

<pallas_src>
import functools

import jax
import jax.numpy as jnp
from jax import lax
from jax.experimental import pallas as pl
from jax.experimental.pallas import tpu as pltpu


def _round_up(v, m):
    return ((v + m - 1) // m) * m


def _mlp_score_kernel(num_layers, out_ch, *refs):
    """refs = (xi_ref, xj_ref, w0, b0, ..., w_{L-1}, b_{L-1}, out_ref).

    Weights are (out_features, in_features); biases are (out_features, 1).
    The last layer's out dim is zero-padded to a multiple of 8 by the wrapper.
    out_ref block is (out_ch, tm): rows live on the lane axis (lane-dense store).
    """
    xi_ref, xj_ref = refs[0], refs[1]
    out_ref = refs[-1]
    wb = refs[2:-1]

    # Elementwise product of the two node embeddings, upcast to f32 first
    # (exact vs the f32 reference; avoids bf16 VALU emulation on v5e).
    x = xi_ref[...].astype(jnp.float32) * xj_ref[...].astype(jnp.float32)  # (tm, in)

    # Layer 0 on feature-major activations: h = W0 @ x^T  -> (out0, tm).
    # Contract the feature dims of W0 (out0, in) and x (tm, in) directly
    # (same lowering as pl.dot(..., trans_b=True)); result is lane-major.
    h = lax.dot_general(
        wb[0][...], x,
        dimension_numbers=(((1,), (1,)), ((), ())),
        preferred_element_type=jnp.float32,
    ) + wb[1][...]

    if num_layers > 1:
        # Hidden layers: Linear -> ReLU.
        # TODO(synk): dropout with p > 0 in training mode is not implemented
        # (module default p=0.0 / eval mode => identity).
        h = jnp.maximum(h, 0.0)
        for layer in range(1, num_layers - 1):
            w = wb[2 * layer][...]
            b = wb[2 * layer + 1][...]
            h = jnp.dot(w, h, preferred_element_type=jnp.float32) + b
            h = jnp.maximum(h, 0.0)
        # Final layer (out dim padded to a multiple of 8 in the wrapper).
        w = wb[2 * (num_layers - 1)][...]
        b = wb[2 * (num_layers - 1) + 1][...]
        h = jnp.dot(w, h, preferred_element_type=jnp.float32) + b        # (ocp, tm)

    logits = h[:out_ch, :]                                               # (out_ch, tm)
    # Sigmoid epilogue: exp runs on the otherwise-idle EUP; only ~tm values per
    # tile, so the exact f32 form costs nothing and matches the f32 reference.
    out_ref[...] = (1.0 / (1.0 + jnp.exp(-logits))).astype(out_ref.dtype)


def mlp_score_forward(x_i, x_j, weights, biases, *, tm=None):
    """weights[k]: (out_k, in_k) (PyTorch nn.Linear layout); biases[k]: (out_k,).

    x_i, x_j: (n, in_channels); bf16 inputs recommended (halves HBM reads).
    Returns (n, out_channels) float32 scores.
    """
    n, in_ch = x_i.shape
    assert x_j.shape == (n, in_ch)
    num_layers = len(weights)
    assert num_layers >= 1 and len(biases) == num_layers
    out_ch = int(weights[-1].shape[0])

    # Large row tiles: amortize the ~0.35us per-grid-step overhead with big
    # dense DMAs; VMEM stays tiny (few MB even at tm=4096) and large n still
    # yields many grid steps so v7x's two TensorCores both get work.
    if tm is None:
        tm = min(4096, _round_up(n, 8))
    tm = _round_up(tm, 8)
    nb = int(pl.cdiv(n, tm))

    # Resident parameters in f32; pad the last layer's out dim to a multiple
    # of 8 (sublane granularity) so the final matmul / slice are well shaped.
    oc_p = _round_up(out_ch, 8)
    w_list = [jnp.asarray(w, jnp.float32) for w in weights]
    b_list = [jnp.asarray(b, jnp.float32).reshape(-1, 1) for b in biases]
    if oc_p != out_ch:
        w_list[-1] = jnp.pad(w_list[-1], ((0, oc_p - out_ch), (0, 0)))
        b_list[-1] = jnp.pad(b_list[-1], ((0, oc_p - out_ch), (0, 0)))

    in_specs = [
        pl.BlockSpec((tm, in_ch), lambda i: (i, 0)),
        pl.BlockSpec((tm, in_ch), lambda i: (i, 0)),
    ]
    flat_wb = []
    for w, b in zip(w_list, b_list):
        # Constant block index => Pallas fetches each parameter once and keeps
        # it resident in VMEM across all grid steps.
        in_specs.append(pl.BlockSpec(w.shape, lambda i: (0, 0)))
        in_specs.append(pl.BlockSpec(b.shape, lambda i: (0, 0)))
        flat_wb += [w, b]

    # Lane-dense output: one (out_ch, tm) block per grid step (leading grid
    # dim squeezed out of the kernel view).
    out_spec = pl.BlockSpec((None, out_ch, tm), lambda i: (i, 0, 0))

    # Advisory cost estimate so XLA can overlap this memory-bound call.
    dims = [in_ch] + [int(w.shape[0]) for w in weights]
    flops = n * in_ch
    for k in range(num_layers):
        flops += n * (2 * dims[k] * dims[k + 1] + dims[k + 1])
    bytes_accessed = (
        int(x_i.size) * x_i.dtype.itemsize + int(x_j.size) * x_j.dtype.itemsize
        + n * out_ch * 4
        + sum(int(w.size) * 4 + int(b.size) * 4 for w, b in zip(w_list, b_list)))
    cost = pl.CostEstimate(flops=int(flops), transcendentals=int(n * out_ch),
                           bytes_accessed=int(bytes_accessed))

    kernel = functools.partial(_mlp_score_kernel, num_layers, out_ch)

    out3 = pl.pallas_call(
        kernel,
        out_shape=jax.ShapeDtypeStruct((nb, out_ch, tm), jnp.float32),
        grid_spec=pltpu.PrefetchScalarGridSpec(
            num_scalar_prefetch=0,
            grid=(nb,),
            in_specs=in_specs,
            out_specs=out_spec,
        ),
        compiler_params=pltpu.CompilerParams(
            dimension_semantics=("parallel",)),
        cost_estimate=cost,
    )(x_i, x_j, *flat_wb)

    # (nb, out_ch, tm) -> (n, out_ch); free relayout when out_ch == 1.
    return jnp.transpose(out3, (0, 2, 1)).reshape(nb * tm, out_ch)[:n]


def _reference(x_i, x_j, weights, biases):
    x = x_i * x_j
    for w, b in zip(weights[:-1], biases[:-1]):
        x = jnp.maximum(x @ w.T + b, 0.0)
    x = x @ weights[-1].T + biases[-1]
    return jax.nn.sigmoid(x)


if __name__ == "__main__":
    # mlp_score(in_channels=32, hidden_channels=32, out_channels=1, num_layers=3)
    in_channels, hidden_channels, out_channels, num_layers = 32, 32, 1, 3

    key = jax.random.PRNGKey(0)
    k_xi, k_xj, *k_params = jax.random.split(key, 2 + 2 * num_layers)

    # Deterministic parameter init (uniform, PyTorch nn.Linear (out, in) layout).
    dims = [in_channels] + [hidden_channels] * (num_layers - 1) + [out_channels]
    weights, biases = [], []
    for layer in range(num_layers):
        fan_in, fan_out = dims[layer], dims[layer + 1]
        bound = 1.0 / (fan_in ** 0.5)
        w = jax.random.uniform(k_params[2 * layer], (fan_out, fan_in),
                               minval=-bound, maxval=bound, dtype=jnp.float32)
        b = jax.random.uniform(k_params[2 * layer + 1], (fan_out,),
                               minval=-bound, maxval=bound, dtype=jnp.float32)
        weights.append(w)
        biases.append(b)

    # Cases: single small tile; multi-tile with explicit tm; default big tile
    # with a padded boundary block (n not a multiple of tm).
    for n, tm in ((200, None), (4096, 1024), (10000, None)):
        ki, kj = jax.random.split(jax.random.fold_in(key, n))
        x_i = jax.random.normal(ki, (n, in_channels), dtype=jnp.float32)
        x_j = jax.random.normal(kj, (n, in_channels), dtype=jnp.float32)

        # bf16 inputs halve HBM read traffic of this bandwidth-bound kernel.
        x_i_bf16 = x_i.astype(jnp.bfloat16)
        x_j_bf16 = x_j.astype(jnp.bfloat16)

        out = mlp_score_forward(x_i_bf16, x_j_bf16, weights, biases, tm=tm)
        out = jax.block_until_ready(out)

        ref = _reference(x_i_bf16.astype(jnp.float32),
                         x_j_bf16.astype(jnp.float32), weights, biases)
        assert out.shape == (n, out_channels)
        assert jnp.allclose(out, ref, atol=1e-5, rtol=1e-4), (n, tm)

    print("KERNEL_OK")
</pallas_src>

<mosaic_0001>
module attributes {stable_mosaic.version = 11 : i64} {
  func.func @_mlp_score_kernel(%arg0: i32, %arg1: memref<200x32xbf16, #tpu.memory_space<vmem>>, %arg2: memref<200x32xbf16, #tpu.memory_space<vmem>>, %arg3: memref<32x32xf32, #tpu.memory_space<vmem>>, %arg4: memref<32x1xf32, #tpu.memory_space<vmem>>, %arg5: memref<32x32xf32, #tpu.memory_space<vmem>>, %arg6: memref<32x1xf32, #tpu.memory_space<vmem>>, %arg7: memref<8x32xf32, #tpu.memory_space<vmem>>, %arg8: memref<8x1xf32, #tpu.memory_space<vmem>>, %arg9: memref<1x1x200xf32, #tpu.memory_space<vmem>>) attributes {dimension_semantics = [#tpu.dimension_semantics<parallel>], iteration_bounds = array<i64: 1>, scalar_prefetch = 0 : i64, scratch_operands = 0 : i64, tpu.core_type = #tpu.core_type<tc>, window_params = [{transform_indices = @transform_0, window_bounds = array<i64: 200, 32>}, {transform_indices = @transform_1, window_bounds = array<i64: 200, 32>}, {pipeline_mode = #tpu.pipeline_mode<synchronous>, transform_indices = @transform_2, window_bounds = array<i64: 32, 32>}, {pipeline_mode = #tpu.pipeline_mode<synchronous>, transform_indices = @transform_3, window_bounds = array<i64: 32, 1>}, {pipeline_mode = #tpu.pipeline_mode<synchronous>, transform_indices = @transform_4, window_bounds = array<i64: 32, 32>}, {pipeline_mode = #tpu.pipeline_mode<synchronous>, transform_indices = @transform_5, window_bounds = array<i64: 32, 1>}, {pipeline_mode = #tpu.pipeline_mode<synchronous>, transform_indices = @transform_6, window_bounds = array<i64: 8, 32>}, {pipeline_mode = #tpu.pipeline_mode<synchronous>, transform_indices = @transform_7, window_bounds = array<i64: 8, 1>}, {transform_indices = @transform_8, window_bounds = array<i64: 1, 1, 200>}]} {
    %c0 = arith.constant 0 : index
    %c0_0 = arith.constant 0 : index
    %0 = vector.load %arg1[%c0, %c0_0] : memref<200x32xbf16, #tpu.memory_space<vmem>>, vector<200x32xbf16>
    %1 = arith.extf %0 : vector<200x32xbf16> to vector<200x32xf32>
    %c0_1 = arith.constant 0 : index
    %c0_2 = arith.constant 0 : index
    %2 = vector.load %arg2[%c0_1, %c0_2] : memref<200x32xbf16, #tpu.memory_space<vmem>>, vector<200x32xbf16>
    %3 = arith.extf %2 : vector<200x32xbf16> to vector<200x32xf32>
    %4 = arith.mulf %1, %3 : vector<200x32xf32>
    %c0_3 = arith.constant 0 : index
    %c0_4 = arith.constant 0 : index
    %5 = vector.load %arg3[%c0_3, %c0_4] : memref<32x32xf32, #tpu.memory_space<vmem>>, vector<32x32xf32>
    %cst = arith.constant dense<0.000000e+00> : vector<32x200xf32>
    %6 = tpu.matmul %5, %4, %cst {dimension_numbers = #tpu.dot_dimension_numbers<[1], [1], [0], [0], [0, 0, 1, 0], [], []>} : vector<32x32xf32>, vector<200x32xf32>, vector<32x200xf32> -> vector<32x200xf32>
    %c0_5 = arith.constant 0 : index
    %c0_6 = arith.constant 0 : index
    %7 = vector.load %arg4[%c0_5, %c0_6] : memref<32x1xf32, #tpu.memory_space<vmem>>, vector<32x1xf32>
    %8 = vector.broadcast %7 : vector<32x1xf32> to vector<32x200xf32>
    %9 = arith.addf %6, %8 : vector<32x200xf32>
    %cst_7 = arith.constant 0.000000e+00 : f32
    %10 = vector.broadcast %cst_7 : f32 to vector<32x200xf32>
    %11 = arith.maximumf %9, %10 : vector<32x200xf32>
    %c0_8 = arith.constant 0 : index
    %c0_9 = arith.constant 0 : index
    %12 = vector.load %arg5[%c0_8, %c0_9] : memref<32x32xf32, #tpu.memory_space<vmem>>, vector<32x32xf32>
    %c0_10 = arith.constant 0 : index
    %c0_11 = arith.constant 0 : index
    %13 = vector.load %arg6[%c0_10, %c0_11] : memref<32x1xf32, #tpu.memory_space<vmem>>, vector<32x1xf32>
    %cst_12 = arith.constant dense<0.000000e+00> : vector<32x200xf32>
    %14 = tpu.matmul %12, %11, %cst_12 {dimension_numbers = #tpu.dot_dimension_numbers<[1], [0], [0], [1], [0, 0, 1, 1], [], []>} : vector<32x32xf32>, vector<32x200xf32>, vector<32x200xf32> -> vector<32x200xf32>
    %15 = vector.broadcast %13 : vector<32x1xf32> to vector<32x200xf32>
    %16 = arith.addf %14, %15 : vector<32x200xf32>
    %cst_13 = arith.constant 0.000000e+00 : f32
    %17 = vector.broadcast %cst_13 : f32 to vector<32x200xf32>
    %18 = arith.maximumf %16, %17 : vector<32x200xf32>
    %c0_14 = arith.constant 0 : index
    %c0_15 = arith.constant 0 : index
    %19 = vector.load %arg7[%c0_14, %c0_15] : memref<8x32xf32, #tpu.memory_space<vmem>>, vector<8x32xf32>
    %c0_16 = arith.constant 0 : index
    %c0_17 = arith.constant 0 : index
    %20 = vector.load %arg8[%c0_16, %c0_17] : memref<8x1xf32, #tpu.memory_space<vmem>>, vector<8x1xf32>
    %cst_18 = arith.constant dense<0.000000e+00> : vector<8x200xf32>
    %21 = tpu.matmul %19, %18, %cst_18 {dimension_numbers = #tpu.dot_dimension_numbers<[1], [0], [0], [1], [0, 0, 1, 1], [], []>} : vector<8x32xf32>, vector<32x200xf32>, vector<8x200xf32> -> vector<8x200xf32>
    %22 = vector.broadcast %20 : vector<8x1xf32> to vector<8x200xf32>
    %23 = arith.addf %21, %22 : vector<8x200xf32>
    %24 = vector.extract_strided_slice %23 {offsets = [0, 0], sizes = [1, 200], strides = [1, 1]} : vector<8x200xf32> to vector<1x200xf32>
    %cst_19 = arith.constant 0.000000e+00 : f32
    %25 = vector.broadcast %cst_19 : f32 to vector<1x200xf32>
    %26 = arith.subf %25, %24 : vector<1x200xf32>
    %27 = math.exp %26 : vector<1x200xf32>
    %cst_20 = arith.constant 1.000000e+00 : f32
    %28 = vector.broadcast %cst_20 : f32 to vector<1x200xf32>
    %29 = arith.addf %28, %27 : vector<1x200xf32>
    %cst_21 = arith.constant 1.000000e+00 : f32
    %30 = vector.broadcast %cst_21 : f32 to vector<1x200xf32>
    %31 = arith.divf %30, %29 : vector<1x200xf32>
    %c0_22 = arith.constant 0 : index
    %c0_23 = arith.constant 0 : index
    %c0_24 = arith.constant 0 : index
    %32 = vector.load %arg9[%c0_22, %c0_23, %c0_24] : memref<1x1x200xf32, #tpu.memory_space<vmem>>, vector<1x1x200xf32>
    %33 = vector.shape_cast %32 : vector<1x1x200xf32> to vector<1x200xf32>
    %34 = vector.shape_cast %31 : vector<1x200xf32> to vector<1x1x200xf32>
    tpu.vector_store %arg9[%c0_22, %c0_23, %c0_24], %34 {strides = array<i32>} : memref<1x1x200xf32, #tpu.memory_space<vmem>>, vector<1x1x200xf32>,
    return
  }
  func.func @transform_0(%arg0: i32) -> (i32, i32) {
    %c0_i32 = arith.constant 0 : i32
    %c0_i32_0 = arith.constant 0 : i32
    return %arg0, %c0_i32 : i32, i32
  }
  func.func @transform_1(%arg0: i32) -> (i32, i32) {
    %c0_i32 = arith.constant 0 : i32
    %c0_i32_0 = arith.constant 0 : i32
    return %arg0, %c0_i32 : i32, i32
  }
  func.func @transform_2(%arg0: i32) -> (i32, i32) {
    %c0_i32 = arith.constant 0 : i32
    %c0_i32_0 = arith.constant 0 : i32
    %c0_i32_1 = arith.constant 0 : i32
    return %c0_i32, %c0_i32_0 : i32, i32
  }
  func.func @transform_3(%arg0: i32) -> (i32, i32) {
    %c0_i32 = arith.constant 0 : i32
    %c0_i32_0 = arith.constant 0 : i32
    %c0_i32_1 = arith.constant 0 : i32
    return %c0_i32, %c0_i32_0 : i32, i32
  }
  func.func @transform_4(%arg0: i32) -> (i32, i32) {
    %c0_i32 = arith.constant 0 : i32
    %c0_i32_0 = arith.constant 0 : i32
    %c0_i32_1 = arith.constant 0 : i32
    return %c0_i32, %c0_i32_0 : i32, i32
  }
  func.func @transform_5(%arg0: i32) -> (i32, i32) {
    %c0_i32 = arith.constant 0 : i32
    %c0_i32_0 = arith.constant 0 : i32
    %c0_i32_1 = arith.constant 0 : i32
    return %c0_i32, %c0_i32_0 : i32, i32
  }
  func.func @transform_6(%arg0: i32) -> (i32, i32) {
    %c0_i32 = arith.constant 0 : i32
    %c0_i32_0 = arith.constant 0 : i32
    %c0_i32_1 = arith.constant 0 : i32
    return %c0_i32, %c0_i32_0 : i32, i32
  }
  func.func @transform_7(%arg0: i32) -> (i32, i32) {
    %c0_i32 = arith.constant 0 : i32
    %c0_i32_0 = arith.constant 0 : i32
    %c0_i32_1 = arith.constant 0 : i32
    return %c0_i32, %c0_i32_0 : i32, i32
  }
  func.func @transform_8(%arg0: i32) -> (i32, i32, i32) {
    %c0_i32 = arith.constant 0 : i32
    %c0_i32_0 = arith.constant 0 : i32
    %c0_i32_1 = arith.constant 0 : i32
    return %arg0, %c0_i32, %c0_i32_0 : i32, i32, i32
  }
}

</mosaic_0001>

<bundles_post_ra>
// kernel: tpu_custom_call.1
= control target key start
LH: loop header
LB: loop body
LE: loop exit
PB: predicated region body
PF: predicated region fallthrough
CT: control target
= control target key end

     0   :  { %vm183_vm0 = vcmask 261120   ;;  %v890_v3 = vmov 0.0|0.0   ;;  %v891_v9 = vmov 0.0   ;;  %s1146_s0 = inlined_call_operand.vmem [shape: bf16[200,32], index: 0, kind: input, shape index: {}]   ;;  %s1147_s1 = inlined_call_operand.vmem [shape: bf16[200,32], index: 1, kind: input, shape index: {}]   ;;  %s1148_s2 = inlined_call_operand.vmem [shape: f32[32,32], index: 2, kind: input, shape index: {}]   ;;  %s1149_s3 = inlined_call_operand.vmem [shape: f32[32,1], index: 3, kind: input, shape index: {}]   ;;  %s1150_s4 = inlined_call_operand.vmem [shape: f32[32,32], index: 4, kind: input, shape index: {}]   ;;  %s1151_s5 = inlined_call_operand.vmem [shape: f32[32,1], index: 5, kind: input, shape index: {}]   ;;  %s1152_s6 = inlined_call_operand.vmem [shape: f32[8,32], index: 6, kind: input, shape index: {}]   ;;  %s1153_s7 = inlined_call_operand.vmem [shape: f32[8,1], index: 7, kind: input, shape index: {}]   ;;  %s1154_s8 = inlined_call_operand.hbm [shape: f32[1,1,200], index: 8, kind: output, shape index: {}]  }
   0x1   :  { %v670_v0 = vld [vmem:[%s1146_s0] sm:$0xff]   ;;  %v765_v2 = vld [vmem:[%s1146_s0 + $0x8] sm:$0xff]   ;;  %787 = vmatprep.subr.bf16.mxu0 %v890_v3  ;;  %335 = vmatprep.mubr.f32.mxu0 %v891_v9  ;;  %vm957_vm1 = vmpackc.low %vm183_vm0, %vm183_vm0 }
   0x2   :  { %v718_v1 = vld [vmem:[%s1147_s1] sm:$0xff]   ;;  %v671_v4 = vunpack.c.l.bf16 %v670_v0  ;;  %v672_v5 = vunpack.c.h.bf16 %v670_v0  ;;  %v776_v8 = vld [vmem:[%s1147_s1 + $0x8] sm:$0xff]   ;;  %v675_v10 = vunpack.c.l.bf16 %v765_v2  ;;  %v676_v11 = vunpack.c.h.bf16 %v765_v2  ;;  %472 = vmatprep.mubr.f32.mxu1 %v891_v9  ;;  %v766_v20 = vld [vmem:[%s1146_s0 + $0x10] sm:$0xff]  }
   0x3   :  { %v719_v6 = vunpack.c.l.bf16 %v718_v1  ;;  %v720_v7 = vunpack.c.h.bf16 %v718_v1  ;;  %v723_v14 = vunpack.c.l.bf16 %v776_v8  ;;  %v724_v15 = vunpack.c.h.bf16 %v776_v8  ;;  %v777_v21 = vld [vmem:[%s1147_s1 + $0x10] sm:$0xff]  }
   0x4   :  { %v679_v22 = vunpack.c.l.bf16 %v766_v20  ;;  %v680_v24 = vunpack.c.h.bf16 %v766_v20  ;;  %v727_v25 = vunpack.c.l.bf16 %v777_v21  ;;  %v728_v26 = vunpack.c.h.bf16 %v777_v21 }
   0x5   :  { %v130_v12 = vmul.f32 %v719_v6, %v671_v4  ;;  %v131_v13 = vmul.f32 %v720_v7, %v672_v5  ;;  %v132_v18 = vmul.f32 %v723_v14, %v675_v10  ;;  %v133_v19 = vmul.f32 %v724_v15, %v676_v11 }
   0x7   :  { %v788_v17 = vpack.c.bf16 %v131_v13, %v130_v12  ;;  %v792_v23 = vpack.c.bf16 %v133_v19, %v132_v18 }
   0x9   :  { %790 = vmatpush1.bf16.xpose.msk.msra.mxu0 %vm957_vm1, %v788_v17 }
   0xa   :  { %791 = vmatprep.subr.bf16.mxu0 %v890_v3 }
   0xb   :  { %13 = vsyncpa [#allocation3], 0  ;;  %v134_v27 = vmul.f32 %v727_v25, %v679_v22  ;;  %v135_v28 = vmul.f32 %v728_v26, %v680_v24  ;;  %v767_v29 = vld [vmem:[%s1146_s0 + $0x18] sm:$0xff]   ;;  %v159_v36 = vld [vmem:[%s1149_s3] sm:$0xff]  ;;  %v892_v38 = vmov 0  }
   0xc   :  { %v778_v30 = vld [vmem:[%s1147_s1 + $0x18] sm:$0xff]   ;;  %v683_v31 = vunpack.c.l.bf16 %v767_v29  ;;  %v684_v33 = vunpack.c.h.bf16 %v767_v29  ;;  %v161_v37 = vld [vmem:[%s1149_s3 + $0x10] sm:$0xff]  ;;  %856 = vset.pattern.permute.xlu0 %v892_v38  ;;  %857 = vset.pattern.permute.xlu1 %v892_v38  ;;  %v768_v41 = vld [vmem:[%s1146_s0 + $0x20] sm:$0xff]  }
   0xd   :  { %v796_v32 = vpack.c.bf16 %v135_v28, %v134_v27  ;;  %v731_v34 = vunpack.c.l.bf16 %v778_v30  ;;  %v732_v35 = vunpack.c.h.bf16 %v778_v30  ;;  %165 = vperm.xlu0 %856, %v159_v36   ;;  %v779_v42 = vld [vmem:[%s1147_s1 + $0x20] sm:$0xff]   ;;  %v160_v43 = vld [vmem:[%s1149_s3 + $0x8] sm:$0xff]  ;;  %175 = vperm.xlu1 %857, %v161_v37   ;;  %v162_v44 = vld [vmem:[%s1149_s3 + $0x18] sm:$0xff]  ;;  %v687_v45 = vunpack.c.l.bf16 %v768_v41 }
   0xe   :  { %v688_v47 = vunpack.c.h.bf16 %v768_v41  ;;  %v735_v48 = vunpack.c.l.bf16 %v779_v42  ;;  %v736_v49 = vunpack.c.h.bf16 %v779_v42  ;;  %v372_v50 = vld [vmem:[%s1151_s5] sm:$0xff]  ;;  %v373_v51 = vld [vmem:[%s1151_s5 + $0x8] sm:$0xff]  ;;  %v374_v56 = vld [vmem:[%s1151_s5 + $0x10] sm:$0xff] }
   0xf   :  { %v136_v39 = vmul.f32 %v731_v34, %v683_v31  ;;  %v137_v40 = vmul.f32 %v732_v35, %v684_v33  ;;  %v769_v54 = vld [vmem:[%s1146_s0 + $0x28] sm:$0xff]   ;;  %v375_v57 = vld [vmem:[%s1151_s5 + $0x18] sm:$0xff]  ;;  %v506_v63 = vld [vmem:[%s1153_s7] sm:$0xff] }
  0x10   :  { %v138_v52 = vmul.f32 %v735_v48, %v687_v45  ;;  %v139_v53 = vmul.f32 %v736_v49, %v688_v47  ;;  %v780_v55 = vld [vmem:[%s1147_s1 + $0x28] sm:$0xff]   ;;  %v691_v58 = vunpack.c.l.bf16 %v769_v54  ;;  %v692_v60 = vunpack.c.h.bf16 %v769_v54  ;;  %v770_v2 = vld [vmem:[%s1146_s0 + $0x30] sm:$0xff]   ;;  %v771_v13 = vld [vmem:[%s1146_s0 + $0x38] sm:$0xff]  }
  0x11   :  { %794 = vmatpush1.bf16.xpose.msk.msra.mxu0 %vm957_vm1, %v792_v23  ;;  %v800_v46 = vpack.c.bf16 %v137_v40, %v136_v39  ;;  %170 = vperm.xlu0 %856, %v160_v43   ;;  %v739_v61 = vunpack.c.l.bf16 %v780_v55  ;;  %v740_v62 = vunpack.c.h.bf16 %v780_v55  ;;  %v781_v4 = vld [vmem:[%s1147_s1 + $0x30] sm:$0xff]   ;;  %v695_v5 = vunpack.c.l.bf16 %v770_v2  ;;  %v782_v14 = vld [vmem:[%s1147_s1 + $0x38] sm:$0xff]   ;;  %v772_v23 = vld [vmem:[%s1146_s0 + $0x40] sm:$0xff]  }
  0x12   :  { %795 = vmatprep.subr.bf16.mxu0 %v890_v3  ;;  %180 = vperm.xlu1 %857, %v162_v44   ;;  %v804_v59 = vpack.c.bf16 %v139_v53, %v138_v52  ;;  %v696_v7 = vunpack.c.h.bf16 %v770_v2  ;;  %v743_v8 = vunpack.c.l.bf16 %v781_v4  ;;  %v744_v10 = vunpack.c.h.bf16 %v781_v4  ;;  %v783_v24 = vld [vmem:[%s1147_s1 + $0x40] sm:$0xff]   ;;  %v784_v33 = vld [vmem:[%s1147_s1 + $0x48] sm:$0xff]   ;;  %v774_v41 = vld [vmem:[%s1146_s0 + $0x50] sm:$0xff]  }
  0x13   :  { %v140_v0 = vmul.f32 %v739_v61, %v691_v58  ;;  %v141_v1 = vmul.f32 %v740_v62, %v692_v60  ;;  %v699_v15 = vunpack.c.l.bf16 %v771_v13  ;;  %v700_v18 = vunpack.c.h.bf16 %v771_v13  ;;  %v785_v42 = vld [vmem:[%s1147_s1 + $0x50] sm:$0xff]   ;;  %v54_v60 = vld [vmem:[%s1146_s0 + $0x60] sm:$0xf]  ;;  %v156_v16 = vld [vmem:[%s1148_s2 + $0x8] sm:$0xff] }
  0x14   :  { %v142_v11 = vmul.f32 %v743_v8, %v695_v5  ;;  %v143_v12 = vmul.f32 %v744_v10, %v696_v7  ;;  %v747_v19 = vunpack.c.l.bf16 %v782_v14  ;;  %v748_v20 = vunpack.c.h.bf16 %v782_v14  ;;  %v104_v61 = vld [vmem:[%s1147_s1 + $0x60] sm:$0xf]  ;;  %v158_v2 = vld [vmem:[%s1148_s2 + $0x18] sm:$0xff] }
  0x15   :  { %378 = vperm.xlu0 %856, %v372_v50   ;;  %v808_v6 = vpack.c.bf16 %v141_v1, %v140_v0  ;;  %v703_v25 = vunpack.c.l.bf16 %v772_v23  ;;  %v704_v27 = vunpack.c.h.bf16 %v772_v23  ;;  %v751_v28 = vunpack.c.l.bf16 %v783_v24  ;;  %v775_v50 = vld [vmem:[%s1146_s0 + $0x58] sm:$0xff]   ;;  %v157_v1 = vld [vmem:[%s1148_s2 + $0x10] sm:$0xff] }
  0x16   :  { %383 = vperm.xlu1 %857, %v373_v51   ;;  %v812_v17 = vpack.c.bf16 %v143_v12, %v142_v11  ;;  %v144_v21 = vmul.f32 %v747_v19, %v699_v15  ;;  %v145_v22 = vmul.f32 %v748_v20, %v700_v18  ;;  %v752_v29 = vunpack.c.h.bf16 %v783_v24  ;;  %v786_v51 = vld [vmem:[%s1147_s1 + $0x58] sm:$0xff]  }
  0x17   :  { %v146_v30 = vmul.f32 %v751_v28, %v703_v25  ;;  %v755_v37 = vunpack.c.l.bf16 %v784_v33  ;;  %v756_v38 = vunpack.c.h.bf16 %v784_v33  ;;  %v711_v43 = vunpack.c.l.bf16 %v774_v41 }
  0x18   :  { %v816_v26 = vpack.c.bf16 %v145_v22, %v144_v21  ;;  %v147_v31 = vmul.f32 %v752_v29, %v704_v27  ;;  %v712_v45 = vunpack.c.h.bf16 %v774_v41  ;;  %v760_v47 = vunpack.c.h.bf16 %v785_v42  ;;  %v371_v41 = vld [vmem:[%s1150_s4 + $0x18] sm:$0xff] }
  0x19   :  { %798 = vmatpush1.bf16.xpose.msk.msra.mxu0 %vm957_vm1, %v796_v32  ;;  %388 = vperm.xlu0 %856, %v374_v56   ;;  %v773_v32 = vld [vmem:[%s1146_s0 + $0x48] sm:$0xff]   ;;  %v715_v52 = vunpack.c.l.bf16 %v775_v50  ;;  %v716_v54 = vunpack.c.h.bf16 %v775_v50  ;;  %v763_v55 = vunpack.c.l.bf16 %v786_v51  ;;  %v764_v56 = vunpack.c.h.bf16 %v786_v51 }
  0x1a   :  { %799 = vmatprep.subr.bf16.mxu0 %v890_v3  ;;  %393 = vperm.xlu1 %857, %v375_v57   ;;  %v707_v34 = vunpack.c.l.bf16 %v773_v32  ;;  %v820_v35 = vpack.c.bf16 %v147_v31, %v146_v30  ;;  %v708_v36 = vunpack.c.h.bf16 %v773_v32  ;;  %v151_v49 = vmul.f32 %v760_v47, %v712_v45 }
  0x1b   :  { %v152_v57 = vmul.f32 %v763_v55, %v715_v52  ;;  %v153_v58 = vmul.f32 %v764_v56, %v716_v54  ;;  %v79_v62 = vunpack.c.l.bf16 %v54_v60 }
  0x1c   :  { %v148_v39 = vmul.f32 %v755_v37, %v707_v34  ;;  %v149_v40 = vmul.f32 %v756_v38, %v708_v36  ;;  %v368_v38 = vld [vmem:[%s1150_s4] sm:$0xff] }
  0x1d   :  { %509 = vperm.xlu0 %856, %v506_v63   ;;  %v129_v63 = vunpack.c.l.bf16 %v104_v61 }
  0x1e   :  { %v824_v44 = vpack.c.bf16 %v149_v40, %v148_v39  ;;  %v369_v39 = vld [vmem:[%s1150_s4 + $0x8] sm:$0xff]  ;;  %v370_v40 = vld [vmem:[%s1150_s4 + $0x10] sm:$0xff] }
  0x1f   :  { %v154_v0 = vmul.f32 %v129_v63, %v79_v62 }
  0x21   :  { %802 = vmatpush1.bf16.xpose.msk.msra.mxu0 %vm957_vm1, %v800_v46  ;;  %v759_v46 = vunpack.c.l.bf16 %v785_v42 }
  0x22   :  { %803 = vmatprep.subr.bf16.mxu0 %v890_v3 }
  0x23   :  { %v150_v48 = vmul.f32 %v759_v46, %v711_v43 }
  0x25   :  { %v828_v53 = vpack.c.bf16 %v151_v49, %v150_v48 }
  0x29   :  { %806 = vmatpush1.bf16.xpose.msk.msra.mxu0 %vm957_vm1, %v804_v59  ;;  %v832_v59 = vpack.c.bf16 %v153_v58, %v152_v57 }
  0x2a   :  { %807 = vmatprep.subr.bf16.mxu0 %v890_v3 }
  0x31   :  { %810 = vmatpush1.bf16.xpose.msk.msra.mxu0 %vm957_vm1, %v808_v6 }
  0x32   :  { %811 = vmatprep.subr.bf16.mxu0 %v890_v3 }
  0x39   :  { %814 = vmatpush1.bf16.xpose.msk.msra.mxu0 %vm957_vm1, %v812_v17 }
  0x3a   :  { %815 = vmatprep.subr.bf16.mxu0 %v890_v3 }
  0x41   :  { %818 = vmatpush1.bf16.xpose.msk.msra.mxu0 %vm957_vm1, %v816_v26 }
  0x42   :  { %819 = vmatprep.subr.bf16.mxu0 %v890_v3 }
  0x49   :  { %822 = vmatpush1.bf16.xpose.msk.msra.mxu0 %vm957_vm1, %v820_v35 }
  0x4a   :  { %823 = vmatprep.subr.bf16.mxu0 %v890_v3 }
  0x51   :  { %826 = vmatpush1.bf16.xpose.msk.msra.mxu0 %vm957_vm1, %v824_v44 }
  0x52   :  { %827 = vmatprep.subr.bf16.mxu0 %v890_v3 }
  0x59   :  { %830 = vmatpush1.bf16.xpose.msk.msra.mxu0 %vm957_vm1, %v828_v53 }
  0x5a   :  { %831 = vmatprep.subr.bf16.mxu0 %v890_v3  ;;  %v155_v3 = vld [vmem:[%s1148_s2] sm:$0xff] }
  0x61   :  { %834 = vmatpush1.bf16.xpose.msk.msra.mxu0 %vm957_vm1, %v832_v59 }
  0x62   :  { %319 = vmatprep.subr.mxu0 %v891_v9 }
  0x69   :  { %659 = vmatpush1.xpose.msk.msra.mxu0 %vm183_vm0, %v154_v0 }
  0x6c   :  { %660 = vmatmul.mubr.msk.f32.vlgmr.msra.gmra.mrb[0].mxu0 %vm183_vm0, %v155_v3 }
  0x6d   :  { %341 = vmatprep.mubr.f32.mxu0 %v891_v9 }
  0x70   :  { %661 = vmatmul.mubr.msk.f32.gmra.mrb[2].mxu0 %vm183_vm0, %v156_v16 }
  0x71   :  { %347 = vmatprep.mubr.f32.mxu0 %v891_v9 }
  0x74   :  { %662 = vmatmul.mubr.msk.f32.gmra.mrb[4].mxu0 %vm183_vm0, %v157_v1 }
  0x75   :  { %353 = vmatprep.mubr.f32.mxu0 %v891_v9 }
  0x78   :  { %663 = vmatmul.mubr.msk.f32.gmra.mrb[6].mxu0 %vm183_vm0, %v158_v2 }
  0x8c   :  { %v166_v4 = vpop.permute.xlu0 %165  ;;  %v176_v14 = vpop.permute.xlu1 %175 }
  0x90   :  { %v171_v8 = vpop.permute.xlu0 %170 }
  0x91   :  { %v181_v26 = vpop.permute.xlu1 %180 }
  0x94   :  { %v379_v44 = vpop.permute.xlu0 %378 }
  0x95   :  { %v384_v46 = vpop.permute.xlu1 %383 }
  0x98   :  { %v389_v59 = vpop.permute.xlu0 %388 }
  0x99   :  { %v394_v61 = vpop.permute.xlu1 %393 }
 0x13f   :  { %v337_v5 = vpop.f32.mrb[0].mxu0 }
 0x140   :  { %v339_v6 = vpop.f32.mrb[1].mxu0  ;;  %v338_v7 = vadd.f32 %v337_v5, %v166_v4 }
 0x141   :  { %v340_v10 = vadd.f32 %v339_v6, %v166_v4 }
 0x142   :  { %v360_v17 = vmax.f32 %v338_v7, 0.0 }
 0x143   :  { %v343_v11 = vpop.f32.mrb[2].mxu0  ;;  %v361_v19 = vmax.f32 %v340_v10, 0.0  ;;  %v510_v10 = vpop.permute.xlu0 %509 }
 0x144   :  { %v344_v12 = vadd.f32 %v343_v11, %v171_v8  ;;  %v345_v13 = vpop.f32.mrb[3].mxu0 }
 0x145   :  { %v346_v15 = vadd.f32 %v345_v13, %v171_v8  ;;  %v505_v8 = vld [vmem:[%s1152_s6] sm:$0xff]  ;;  %s894_s6 = smov [#allocation2]  }
 0x146   :  { %v362_v18 = vmax.f32 %v344_v12, 0.0  ;;  %s627_s16 = sshll.u32 %s894_s6, 4  ;;  %s628_s16 = int_to_ptr.vmem [resolvable:$true] %s627_s16 }
 0x147   :  { %v363_v20 = vmax.f32 %v346_v15, 0.0  ;;  %v349_v21 = vpop.f32.mrb[4].mxu0  ;;  %s866_s17 = scalar_lea.vmem %s628_s16, 32  ;;  %p871_p1 = scmp.lt.s32.totalorder %s628_s16, %s628_s16 }
 0x148   :  { %v351_v22 = vpop.f32.mrb[5].mxu0  ;;  %v837_v23 = vpack.c.bf16 %v362_v18, %v360_v17  ;;  %v350_v25 = vadd.f32 %v349_v21, %v176_v14  ;;  %p867_p0 = scmp.ne.s32.totalorder %s628_s16, %s866_s17  ;;  %p872_p2 = scmp.lt.s32.totalorder %s866_s17, %s866_s17 }
 0x149   :  { %v835_v24 = vpack.c.bf16 %v363_v20, %v361_v19  ;;  %v352_v27 = vadd.f32 %v351_v22, %v176_v14 }
 0x14a   :  { %v364_v32 = vmax.f32 %v350_v25, 0.0  ;;  %p873_p3 = por %p872_p2, %p871_p1 }
 0x14b   :  { %v355_v28 = vpop.f32.mrb[6].mxu0  ;;  %836 = vmatprep.subr.bf16.mxu1 %v835_v24  ;;  %v365_v34 = vmax.f32 %v352_v27, 0.0  ;;  %v893_v24 = vmov 1966171168  }
 0x14c   :  { %v356_v29 = vadd.f32 %v355_v28, %v181_v26  ;;  %v357_v30 = vpop.f32.mrb[7].mxu0  ;;  %838 = vmatpush1.bf16.msra.mxu1 %v837_v23  ;;  %v602_v25 = vunpack.c.l.s4 %v893_v24  ;;  %p874_p4 = pnand %p873_p3, %p867_p0 }
 0x14d   :  { %v358_v31 = vadd.f32 %v357_v30, %v181_v26  ;;  %v604_v26 = vlaneseq }
 0x14e   :  { %v366_v33 = vmax.f32 %v356_v29, 0.0  ;;  %v603_v27 = vunpack.c.0.s8 %v602_v25 }
 0x14f   :  { %v367_v35 = vmax.f32 %v358_v31, 0.0  ;;  %v605_v28 = vshrl.u32 %v604_v26, 7  ;;  %vm618_vm2 = vcmp.lt.s32.totalorder %v604_v26, 200 }
 0x150   :  { %v841_v36 = vpack.c.bf16 %v366_v33, %v364_v32 }
 0x151   :  { %v839_v37 = vpack.c.bf16 %v367_v35, %v365_v34  ;;  %v606_v30 = vsub.s32 %v603_v27, %v605_v28 }
 0x153   :  { %840 = vmatprep.subr.bf16.mxu1 %v839_v37 }
 0x154   :  { %842 = vmatpush1.bf16.msra.mxu1 %v841_v36 }
 0x157   :  { %664 = vmatmul.mubr.msk.f32.vlgmr.msra.gmra.mrb[0].mxu1 %vm183_vm0, %v368_v38 }
 0x158   :  { %478 = vmatprep.mubr.f32.mxu1 %v891_v9 }
 0x15b   :  { %665 = vmatmul.mubr.msk.f32.gmra.mrb[2].mxu1 %vm183_vm0, %v369_v39 }
 0x15c   :  { %484 = vmatprep.mubr.f32.mxu1 %v891_v9 }
 0x15f   :  { %666 = vmatmul.mubr.msk.f32.gmra.mrb[4].mxu1 %vm183_vm0, %v370_v40 }
 0x160   :  { %490 = vmatprep.mubr.f32.mxu1 %v891_v9 }
 0x163   :  { %667 = vmatmul.mubr.msk.f32.gmra.mrb[6].mxu1 %vm183_vm0, %v371_v41 }
 0x164   :  { %579 = vmatprep.mubr.f32.mxu1 %v891_v9 }
 0x22a   :  { %v474_v42 = vpop.f32.mrb[0].mxu1 }
 0x22b   :  { %v476_v43 = vpop.f32.mrb[1].mxu1  ;;  %v475_v45 = vadd.f32 %v474_v42, %v379_v44 }
 0x22c   :  { %v477_v47 = vadd.f32 %v476_v43, %v379_v44 }
 0x22d   :  { %v497_v52 = vmax.f32 %v475_v45, 0.0 }
 0x22e   :  { %v480_v48 = vpop.f32.mrb[2].mxu1  ;;  %v498_v54 = vmax.f32 %v477_v47, 0.0 }
 0x22f   :  { %v481_v49 = vadd.f32 %v480_v48, %v384_v46  ;;  %v482_v50 = vpop.f32.mrb[3].mxu1 }
 0x230   :  { %v483_v51 = vadd.f32 %v482_v50, %v384_v46 }
 0x231   :  { %v499_v53 = vmax.f32 %v481_v49, 0.0 }
 0x232   :  { %v500_v55 = vmax.f32 %v483_v51, 0.0  ;;  %v486_v56 = vpop.f32.mrb[4].mxu1 }
 0x233   :  { %v845_v57 = vpack.c.bf16 %v499_v53, %v497_v52  ;;  %v488_v58 = vpop.f32.mrb[5].mxu1  ;;  %v487_v9 = vadd.f32 %v486_v56, %v389_v59 }
 0x234   :  { %v843_v60 = vpack.c.bf16 %v500_v55, %v498_v54  ;;  %v489_v62 = vadd.f32 %v488_v58, %v389_v59 }
 0x235   :  { %v501_v1 = vmax.f32 %v487_v9, 0.0 }
 0x236   :  { %v492_v63 = vpop.f32.mrb[6].mxu1  ;;  %844 = vmatprep.subr.bf16.mxu1 %v843_v60  ;;  %v502_v4 = vmax.f32 %v489_v62, 0.0 }
 0x237   :  { %v493_v0 = vadd.f32 %v492_v63, %v394_v61  ;;  %v494_v3 = vpop.f32.mrb[7].mxu1  ;;  %846 = vmatpush1.bf16.msra.mxu1 %v845_v57 }
 0x238   :  { %v495_v16 = vadd.f32 %v494_v3, %v394_v61 }
 0x239   :  { %v503_v2 = vmax.f32 %v493_v0, 0.0 }
 0x23a   :  { %v504_v5 = vmax.f32 %v495_v16, 0.0 }
 0x23b   :  { %v849_v6 = vpack.c.bf16 %v503_v2, %v501_v1 }
 0x23c   :  { %v847_v7 = vpack.c.bf16 %v504_v5, %v502_v4 }
 0x23e   :  { %848 = vmatprep.subr.bf16.mxu1 %v847_v7 }
 0x23f   :  { %850 = vmatpush1.bf16.msra.mxu1 %v849_v6 }
 0x242   :  { %668 = vmatmul.mubr.msk.f32.vlgmr.msra.gmra.mrb[8].mxu1 %vm183_vm0, %v505_v8 }
 0x315   :  { %v581_v11 = vpop.f32.mrb[8].mxu1 }
 0x316   :  { %v582_v12 = vadd.f32 %v581_v11, %v510_v10  ;;  %v583_v13 = vpop.f32.mrb[9].mxu1 }
 0x317   :  { %v584_v14 = vadd.f32 %v583_v13, %v510_v10 }
 0x318   :  { %v586_v15 = vsub.f32 0.0, %v582_v12 }
 0x319   :  { %v587_v17 = vsub.f32 0.0, %v584_v14 }
 0x31a   :  { %v588_v18 = vmul.f32 1.442695, %v586_v15 }
 0x31b   :  { %v590_v19 = vmul.f32 1.442695, %v587_v17 }
 0x31c   :  { %858 = vpow2.f32 %v588_v18 }
 0x31d   :  { %860 = vpow2.f32 %v590_v19 }
 0x326   :  { %v859_v20 = vpop.eup %858 }
 0x327   :  { %v861_v21 = vpop.eup %860  ;;  %v592_v22 = vadd.f32 1.0, %v859_v20 }
 0x328   :  { %v593_v23 = vadd.f32 1.0, %v861_v21 }
 0x329   :  { %862 = vrcp.f32 %v592_v22 }
 0x32a   :  { %864 = vrcp.f32 %v593_v23 }
 0x333   :  { %v863_v29 = vpop.eup %862 }
 0x334   :  { %v865_v31 = vpop.eup %864 }
 0x335   :  { %v600_v32 = vcombine.low %v863_v29, %v865_v31 }
 0x337   :  { %v607_v33 = vrot.slane %v600_v32, %v606_v30 }
 0x339   :  { %v614_v34 = vrot.slane %v607_v33, %v606_v30 }
 0x33b   :  { %620 = vst.msk [vmem:[#allocation2] sm:$0x3] %vm618_vm2, %v614_v34 }
 0x33c   :  { %877 = shalt.err (!%p874_p4)
}
 0x33d   :  { %s878_s20 = scalar_lea.hbm %s1154_s8, 32 }
 0x33e   :  { %p879_p5 = scmp.ne.s32.totalorder %s1154_s8, %s878_s20  ;;  %p882_p6 = scmp.lt.u32.totalorder %s878_s20, %s1154_s8 }
 0x340   :  { %p884_p7 = pnand %p882_p6, %p879_p5 }
 0x342   :  { %887 = shalt.err (!%p884_p7)
}
 0x343   :  { %630 = dma.vmem_to_hbm [thread:$0]  %s628_s16, 32, %s1154_s8, [#allocation3]  }
 0x344   :  { %888 = dma.done.wait [#allocation3], 32  }
 0x345   :  { %889 = vsyncadd [#allocation3], 4294967264 }
 0x346   :  { %634 = vsyncpa [#allocation3], 1 }

</bundles_post_ra>
